<compile_context>
chip_gen: v6e
topology: v6e:2x2x1
jax: 0.10.0
libtpu: 0.0.40
codegen_flags: <defaults>
</compile_context>

<pallas_src>
import jax
import jax.numpy as jnp
from jax.experimental import pallas as pl
from jax.experimental.pallas import tpu as pltpu


def _round_up(x, m):
    return ((x + m - 1) // m) * m


def _patch_embed_kernel(x_ref, w_ref, b_ref, o_ref):
    # x_ref: (TM, K) patch tile, w_ref: (K, E), b_ref: (1, E), o_ref: (TM, E)
    acc = jnp.dot(x_ref[...], w_ref[...], preferred_element_type=jnp.float32)
    o_ref[...] = (acc + b_ref[...]).astype(o_ref.dtype)


def _choose_tile_m(M, tile_m, K, E):
    """Pick the M-tile: big (HBM-bound kernel), multiple of 8, VMEM-budgeted,
    preferring an exact divisor of M (no ragged edge block), and >=2 grid steps
    for large M so the 'parallel' axis spans both v7x TensorCores."""
    # Double-buffered x tile + out tile, both lane-padded to 128 in VMEM.
    bytes_per_row = 2 * 4 * (_round_up(K, 128) + _round_up(E, 128))
    vmem_budget = 40 * 1024 * 1024
    tm_cap = max(8, (vmem_budget // bytes_per_row) // 8 * 8)
    tile_m = min(tile_m, tm_cap)

    if M <= tile_m:
        # Single block covers the full (possibly non-multiple-of-8) M dim — legal
        # because block dim == full array dim.  Split in two for megacore only if
        # each half is still a decent-sized tile.
        if M >= 8192 and M % 16 == 0:
            return M // 2
        return M

    tm = (tile_m // 8) * 8
    # Search a small window below tile_m for a divisor of M (avoids a ragged
    # last block entirely).  Falls back to a ragged edge, which Pallas masks.
    for cand in range(tm, max(7, tm - 4096), -8):
        if M % cand == 0:
            return cand
    return tm


def patch_embed_forward(x, weight, bias, patch_size, *, tile_m=8192, out_dtype=None):
    """x: (B, C, H, W). weight: (E, C, ph, pw). bias: (E,). Returns (B, N, E)."""
    B, C, H, W = x.shape
    E = weight.shape[0]
    ph, pw = patch_size
    assert H % ph == 0 and W % pw == 0
    Ho, Wo = H // ph, W // pw
    N = Ho * Wo
    K = C * ph * pw
    M = B * N
    out_dtype = x.dtype if out_dtype is None else out_dtype

    # --- patchify: pure reshape/transpose, candidate for input fusion ---
    # (B, C, Ho, ph, Wo, pw) -> (B, Ho, Wo, C, ph, pw) -> (B*N, K)
    xp = x.reshape(B, C, Ho, ph, Wo, pw)
    xp = jnp.transpose(xp, (0, 2, 4, 1, 3, 5)).reshape(M, K)

    # Conv weight flattened exactly as PyTorch flattens it: (E, C*ph*pw) -> (K, E)
    w_mat = weight.reshape(E, K).T
    b_mat = bias.reshape(1, E)

    TM = _choose_tile_m(M, tile_m, K, E)
    grid_m = pl.cdiv(M, TM)

    cost = pl.CostEstimate(
        flops=2 * M * K * E,
        transcendentals=0,
        bytes_accessed=4 * (M * K + K * E + E) + jnp.dtype(out_dtype).itemsize * M * E,
    )

    out = pl.pallas_call(
        _patch_embed_kernel,
        out_shape=jax.ShapeDtypeStruct((M, E), out_dtype),
        grid_spec=pl.GridSpec(
            grid=(grid_m,),
            in_specs=[
                pl.BlockSpec((TM, K), lambda i: (i, 0)),   # x tile: marches over M
                pl.BlockSpec((K, E), lambda i: (0, 0)),    # weight: resident
                pl.BlockSpec((1, E), lambda i: (0, 0)),    # bias: resident
            ],
            out_specs=pl.BlockSpec((TM, E), lambda i: (i, 0)),
        ),
        compiler_params=pltpu.CompilerParams(
            dimension_semantics=("parallel",),
            vmem_limit_bytes=48 * 1024 * 1024,
            allow_input_fusion=[True, False, False],
        ),
        cost_estimate=cost,
    )(xp, w_mat, b_mat)

    # (M, E) -> (B, N, E): pure split of the leading dim, no data movement.
    return out.reshape(B, N, E)


def reference_forward(x, weight, bias, patch_size):
    """Pure-JAX reference: conv2d with stride == kernel, then flatten(2).transpose(1,2)."""
    y = jax.lax.conv_general_dilated(
        x, weight,
        window_strides=patch_size,
        padding="VALID",
        dimension_numbers=("NCHW", "OIHW", "NCHW"),
    )
    y = y + bias.reshape(1, -1, 1, 1)
    B, E, Ho, Wo = y.shape
    return jnp.transpose(y.reshape(B, E, Ho * Wo), (0, 2, 1))


if __name__ == "__main__":
    # Small shapes consistent with the module: img_size=16, patch_size=4,
    # in_chans=4, embed_dim=32, batch=2.  norm_layer=None (default) -> no norm.
    B, C, H, W = 2, 4, 16, 16
    patch_size = (4, 4)
    embed_dim = 32

    key = jax.random.PRNGKey(0)
    kx, kw, kb = jax.random.split(key, 3)

    x = jax.random.normal(kx, (B, C, H, W), dtype=jnp.float32)
    # Deterministic "Conv2d" parameter init (synthetic, not a checkpoint).
    fan_in = C * patch_size[0] * patch_size[1]
    weight = jax.random.normal(kw, (embed_dim, C, *patch_size), dtype=jnp.float32) * (fan_in ** -0.5)
    bias = jax.random.normal(kb, (embed_dim,), dtype=jnp.float32) * 0.01

    fwd = jax.jit(lambda x, w, b: patch_embed_forward(x, w, b, patch_size))
    out = fwd(x, weight, bias)
    out = jax.block_until_ready(out)

    ref = reference_forward(x, weight, bias, patch_size)
    assert out.shape == (B, (H // patch_size[0]) * (W // patch_size[1]), embed_dim)
    assert jnp.allclose(out, ref, atol=1e-4, rtol=1e-4), float(jnp.max(jnp.abs(out - ref)))

    print("KERNEL_OK")
</pallas_src>

<mosaic_0001>
module attributes {stable_mosaic.version = 11 : i64} {
  func.func @_patch_embed_kernel(%arg0: i32, %arg1: memref<32x64xf32, #tpu.memory_space<vmem>>, %arg2: memref<64x32xf32, #tpu.memory_space<vmem>>, %arg3: memref<1x32xf32, #tpu.memory_space<vmem>>, %arg4: memref<32x32xf32, #tpu.memory_space<vmem>>) attributes {dimension_semantics = [#tpu.dimension_semantics<parallel>], iteration_bounds = array<i64: 1>, scalar_prefetch = 0 : i64, scratch_operands = 0 : i64, tpu.core_type = #tpu.core_type<tc>, window_params = [{transform_indices = @transform_0, window_bounds = array<i64: 32, 64>}, {pipeline_mode = #tpu.pipeline_mode<synchronous>, transform_indices = @transform_1, window_bounds = array<i64: 64, 32>}, {pipeline_mode = #tpu.pipeline_mode<synchronous>, transform_indices = @transform_2, window_bounds = array<i64: 1, 32>}, {transform_indices = @transform_3, window_bounds = array<i64: 32, 32>}]} {
    %c0 = arith.constant 0 : index
    %c0_0 = arith.constant 0 : index
    %0 = vector.load %arg1[%c0, %c0_0] : memref<32x64xf32, #tpu.memory_space<vmem>>, vector<32x64xf32>
    %c0_1 = arith.constant 0 : index
    %c0_2 = arith.constant 0 : index
    %1 = vector.load %arg2[%c0_1, %c0_2] : memref<64x32xf32, #tpu.memory_space<vmem>>, vector<64x32xf32>
    %cst = arith.constant dense<0.000000e+00> : vector<32x32xf32>
    %2 = tpu.matmul %0, %1, %cst {dimension_numbers = #tpu.dot_dimension_numbers<[1], [0], [0], [1], [0, 0, 1, 1], [], []>} : vector<32x64xf32>, vector<64x32xf32>, vector<32x32xf32> -> vector<32x32xf32>
    %c0_3 = arith.constant 0 : index
    %c0_4 = arith.constant 0 : index
    %3 = vector.load %arg3[%c0_3, %c0_4] : memref<1x32xf32, #tpu.memory_space<vmem>>, vector<1x32xf32>
    %4 = vector.broadcast %3 : vector<1x32xf32> to vector<32x32xf32>
    %5 = arith.addf %2, %4 : vector<32x32xf32>
    %c0_5 = arith.constant 0 : index
    %c0_6 = arith.constant 0 : index
    %6 = vector.load %arg4[%c0_5, %c0_6] : memref<32x32xf32, #tpu.memory_space<vmem>>, vector<32x32xf32>
    tpu.vector_store %arg4[%c0_5, %c0_6], %5 {strides = array<i32>} : memref<32x32xf32, #tpu.memory_space<vmem>>, vector<32x32xf32>,
    return
  }
  func.func @transform_0(%arg0: i32) -> (i32, i32) {
    %c0_i32 = arith.constant 0 : i32
    %c0_i32_0 = arith.constant 0 : i32
    return %arg0, %c0_i32 : i32, i32
  }
  func.func @transform_1(%arg0: i32) -> (i32, i32) {
    %c0_i32 = arith.constant 0 : i32
    %c0_i32_0 = arith.constant 0 : i32
    %c0_i32_1 = arith.constant 0 : i32
    return %c0_i32, %c0_i32_0 : i32, i32
  }
  func.func @transform_2(%arg0: i32) -> (i32, i32) {
    %c0_i32 = arith.constant 0 : i32
    %c0_i32_0 = arith.constant 0 : i32
    %c0_i32_1 = arith.constant 0 : i32
    return %c0_i32, %c0_i32_0 : i32, i32
  }
  func.func @transform_3(%arg0: i32) -> (i32, i32) {
    %c0_i32 = arith.constant 0 : i32
    %c0_i32_0 = arith.constant 0 : i32
    return %arg0, %c0_i32 : i32, i32
  }
}

</mosaic_0001>

<bundles_post_ra>
// kernel: _lambda_.1
= control target key start
LH: loop header
LB: loop body
LE: loop exit
PB: predicated region body
PF: predicated region fallthrough
CT: control target
= control target key end

     0   :  { %s298_s0 = inlined_call_operand.vmem [shape: f32[32,64], index: 0, kind: input, shape index: {}]   ;;  %s299_s1 = inlined_call_operand.vmem [shape: f32[64,32], index: 1, kind: input, shape index: {}]   ;;  %s300_s2 = inlined_call_operand.vmem [shape: f32[1,32], index: 2, kind: input, shape index: {}]   ;;  %s301_s3 = inlined_call_operand.hbm [shape: f32[32,32], index: 3, kind: output, shape index: {}]  }
   0x1   :  { %v26_v0 = vld [vmem:[%s299_s1 + $0x38] sm:$0xff]  ;;  %v25_v1 = vld [vmem:[%s299_s1 + $0x30] sm:$0xff]  ;;  %v24_v2 = vld [vmem:[%s299_s1 + $0x28] sm:$0xff] }
   0x2   :  { %170 = vmatprep.subr.mxu0 %v26_v0  ;;  %192 = vmatprep.subr.mxu1 %v26_v0  ;;  %v23_v3 = vld [vmem:[%s299_s1 + $0x20] sm:$0xff] }
   0x3   :  { %171 = vmatpush3.msra.mxu0 %v26_v0  ;;  %200 = vmatpush3.msra.mxu1 %v26_v0 }
   0x4   :  { %172 = vmatprep.subr.mxu0 %v25_v1  ;;  %193 = vmatprep.subr.mxu1 %v25_v1 }
   0x5   :  { %173 = vmatpush3.msra.mxu0 %v25_v1  ;;  %201 = vmatpush3.msra.mxu1 %v25_v1 }
   0x6   :  { %8 = vsyncpa [#allocation3], 0  ;;  %174 = vmatprep.subr.mxu0 %v24_v2  ;;  %194 = vmatprep.subr.mxu1 %v24_v2  ;;  %v22_v4 = vld [vmem:[%s299_s1 + $0x18] sm:$0xff]  ;;  %v21_v5 = vld [vmem:[%s299_s1 + $0x10] sm:$0xff]  ;;  %vm34_vm0 = vcmask 523264   ;;  %s233_s10 = smov [#allocation2]  }
   0x7   :  { %175 = vmatpush3.msra.mxu0 %v24_v2  ;;  %202 = vmatpush3.msra.mxu1 %v24_v2  ;;  %v20_v6 = vld [vmem:[%s299_s1 + $0x8] sm:$0xff]  ;;  %v19_v7 = vld [vmem:[%s299_s1] sm:$0xff]  ;;  %v17_v9 = vld [vmem:[%s298_s0 + $0x10] sm:$0xff]  ;;  %s142_s11 = sshll.u32 %s233_s10, 4  ;;  %vm132_vm1 = vcmask 261120   ;;  %s143_s11 = int_to_ptr.vmem [resolvable:$true] %s142_s11 }
   0x8   :  { %176 = vmatprep.subr.mxu0 %v23_v3  ;;  %195 = vmatprep.subr.mxu1 %v23_v3  ;;  %v15_v8 = vld [vmem:[%s298_s0] sm:$0xff]  ;;  %v16_v10 = vld [vmem:[%s298_s0 + $0x8] sm:$0xff]  ;;  %v18_v11 = vld [vmem:[%s298_s0 + $0x18] sm:$0xff]  ;;  %s211_s0 = scalar_lea.vmem %s143_s11, 512  ;;  %p216_p1 = scmp.lt.s32.totalorder %s143_s11, %s143_s11 }
   0x9   :  { %177 = vmatpush3.msra.mxu0 %v23_v3  ;;  %203 = vmatpush3.msra.mxu1 %v23_v3  ;;  %v153_v12 = vld [vmem:[%s300_s2] ss:$0 sm:$0xff]  ;;  %p212_p0 = scmp.ne.s32.totalorder %s143_s11, %s211_s0  ;;  %p217_p2 = scmp.lt.s32.totalorder %s211_s0, %s211_s0 }
   0xa   :  { %178 = vmatprep.subr.mxu0 %v22_v4  ;;  %196 = vmatprep.subr.mxu1 %v22_v4 }
   0xb   :  { %179 = vmatpush3.msra.mxu0 %v22_v4  ;;  %204 = vmatpush3.msra.mxu1 %v22_v4  ;;  %p218_p3 = por %p217_p2, %p216_p1 }
   0xc   :  { %180 = vmatprep.subr.mxu0 %v21_v5  ;;  %197 = vmatprep.subr.mxu1 %v21_v5 }
   0xd   :  { %181 = vmatpush3.msra.mxu0 %v21_v5  ;;  %205 = vmatpush3.msra.mxu1 %v21_v5  ;;  %p219_p4 = pnand %p218_p3, %p212_p0 }
   0xe   :  { %182 = vmatprep.subr.mxu0 %v20_v6  ;;  %198 = vmatprep.subr.mxu1 %v20_v6 }
   0xf   :  { %183 = vmatpush3.msra.mxu0 %v20_v6  ;;  %206 = vmatpush3.msra.mxu1 %v20_v6 }
  0x10   :  { %184 = vmatprep.subr.mxu0 %v19_v7  ;;  %199 = vmatprep.subr.mxu1 %v19_v7 }
  0x11   :  { %185 = vmatpush3.msra.mxu0 %v19_v7  ;;  %207 = vmatpush3.msra.mxu1 %v19_v7 }
  0x12   :  { %186 = vmatprep.mubr.msk.f32.mxu0 %vm34_vm0, %v15_v8  ;;  %189 = vmatprep.mubr.msk.f32.mxu1 %vm34_vm0, %v17_v9 }
  0x13   :  { %187 = vmatmul.mubr.msk.f32.vlgmr.msra.gmra.mxu0 %vm34_vm0, %v16_v10  ;;  %190 = vmatmul.mubr.msk.f32.vlgmr.msra.gmra.mxu1 %vm34_vm0, %v18_v11 }
  0xd3   :  { %v188_v13 = vpop.f32.mrf.mxu0  ;;  %v191_v14 = vpop.f32.mrf.mxu1 }
  0xd4   :  { %v119_v15 = vadd.f32 %v188_v13, %v153_v12  ;;  %v129_v16 = vadd.f32 %v191_v14, %v153_v12 }
  0xd5   :  { %v113_v17 = vpop.f32.mrf.mxu0  ;;  %v123_v18 = vpop.f32.mrf.mxu1 }
  0xd6   :  { %134 = vst.msk [vmem:[#allocation2 + $0x8] sm:$0xff] %vm132_vm1, %v119_v15  ;;  %136 = vst.msk [vmem:[#allocation2 + $0x18] sm:$0xff] %vm132_vm1, %v129_v16  ;;  %v114_v19 = vadd.f32 %v153_v12, %v113_v17  ;;  %v124_v20 = vadd.f32 %v153_v12, %v123_v18 }
  0xd8   :  { %133 = vst.msk [vmem:[#allocation2] sm:$0xff] %vm132_vm1, %v114_v19  ;;  %135 = vst.msk [vmem:[#allocation2 + $0x10] sm:$0xff] %vm132_vm1, %v124_v20 }
  0xd9   :  { %222 = shalt.err (!%p219_p4)
}
  0xda   :  { %s234_s2 = smov 128   ;;  %s235_s12 = smov 8  }
  0xdb   :  { %148 = dma.vmem_to_hbm [thread:$0]  %s143_s11, 512, %s301_s3, [#allocation3], %s234_s2, %s234_s2, %s235_s12  }
  0xdc   :  { %231 = dma.done.wait [#allocation3], 512  }
  0xdd   :  { %232 = vsyncadd [#allocation3], 4294966784 }
  0xde   :  { %152 = vsyncpa [#allocation3], 1 }

</bundles_post_ra>
